<compile_context>
chip_gen: v5e
topology: v5e:2x2
jax: 0.10.0
libtpu: 0.0.40
codegen_flags: <defaults>
</compile_context>

<pallas_src>
import jax
import jax.numpy as jnp
from jax.experimental import pallas as pl
from jax.experimental.pallas import tpu as pltpu


def _round_up(n, m):
    return ((n + m - 1) // m) * m


def _make_kernel(compute_dtype, tk, d_in, has_k_rem, tk_aligned):
    """Build the kernel body with the static tiling parameters closed over."""

    def kernel(x_ref, vt_ref, ut_ref, o_ref, xv_acc):
        # x:(tb, tk)  Vt(resident):(Kp, R)  Ut(resident):(R, D_out) -> o:(tb, D_out)
        k = pl.program_id(1)

        @pl.when(k == 0)
        def _():
            xv_acc[...] = jnp.zeros_like(xv_acc)

        xt = x_ref[...]
        # Per-tile cast (free VPU work under the DMA) instead of a wrapper pass.
        if xt.dtype != compute_dtype:
            xt = xt.astype(compute_dtype)
        if has_k_rem:
            # Last reduction tile extends past D_in: columns beyond the valid
            # range are unspecified VMEM contents; zero them so they cannot
            # pollute the reduction (NaN * 0 == NaN otherwise).
            valid = jnp.minimum(d_in - k * tk, tk)
            col = jax.lax.broadcasted_iota(jnp.int32, xt.shape, 1)
            xt = jnp.where(col < valid, xt, jnp.zeros_like(xt))

        start = k * tk
        if tk_aligned:
            start = pl.multiple_of(start, 128)
        vt = vt_ref[pl.ds(start, tk), :]

        # Partial (x @ Vt) over this D_in tile: (tb, R), f32 accumulation.
        xv_acc[...] += jnp.dot(xt, vt, preferred_element_type=jnp.float32)

        @pl.when(k == pl.num_programs(1) - 1)
        def _():
            # Tiny rank-R second matmul + lane-dense store, once per batch tile.
            xv = xv_acc[...].astype(ut_ref.dtype)
            o_ref[...] = jnp.dot(
                xv, ut_ref[...], preferred_element_type=jnp.float32
            ).astype(o_ref.dtype)

    return kernel


def lowrank_linear(x, U, V, *, tb=256, tk=None, compute_dtype=None,
                   vmem_limit_bytes=None, x_buffer_count=2):
    """out = x @ (U @ V).T  computed as (x @ V.T) @ U.T in one Pallas kernel.

    x : (B, D_in), U : (D_out, R), V : (R, D_in)  ->  (B, D_out)

    Pass compute_dtype=jnp.bfloat16 for the fast MXU path (accumulation stays
    f32 via preferred_element_type; the f32 rank-R intermediate is cast back
    to bf16 before the second matmul, so results differ slightly from a pure
    f32 reference).
    """
    B, D_in = x.shape
    D_out, R = U.shape
    assert V.shape == (R, D_in)
    out_dtype = x.dtype
    cd = jnp.dtype(compute_dtype) if compute_dtype is not None else jnp.dtype(x.dtype)

    # Tiny weights: transpose + optional cast on the wrapper side is cheap and
    # keeps both in-kernel matmuls as plain MXU-friendly contractions.
    Vt = jnp.transpose(V).astype(cd)   # (D_in, R)
    Ut = jnp.transpose(U).astype(cd)   # (R, D_out)

    # ---- reduction (D_in) tiling: never pad or copy x -----------------------
    if tk is None:
        tk = 4096 if jnp.dtype(x.dtype).itemsize <= 2 else 2048
    if D_in <= tk:
        tk = D_in                      # single step; full-dim block, no pad
    else:
        tk = max(128, (tk // 128) * 128)
    num_k = pl.cdiv(D_in, tk)
    Kp = num_k * tk
    has_k_rem = (Kp != D_in)
    tk_aligned = (tk % 128 == 0)
    if has_k_rem:
        # Only the tiny Vt gets zero-padded; x's K remainder is masked in-kernel.
        Vt = jnp.pad(Vt, ((0, Kp - D_in), (0, 0)))

    # ---- batch tiling: never pad x; OOB rows are dropped on store -----------
    if B <= tb:
        tb = B
        if B > 8:
            # Ensure >= 2 "parallel" tiles so both v7x TensorCores get work.
            tb = min(B, _round_up(pl.cdiv(B, 2), 8))
    else:
        tb = max(8, (tb // 8) * 8)
    num_b = pl.cdiv(B, tb)

    grid = (num_b, num_k)

    # ---- VMEM plan & limit ---------------------------------------------------
    x_itemsize = jnp.dtype(x.dtype).itemsize
    out_itemsize = jnp.dtype(out_dtype).itemsize
    need = (max(2, x_buffer_count) * tb * tk * x_itemsize      # x stream buffers
            + 2 * Kp * R * cd.itemsize                         # resident Vt
            + 2 * R * D_out * cd.itemsize                      # resident Ut
            + 2 * tb * D_out * out_itemsize                    # output buffers
            + tb * R * 4 + tb * D_out * 4)                     # acc + epilogue
    if vmem_limit_bytes is None:
        vmem_limit_bytes = min(100 * 1024 * 1024,
                               max(32 * 1024 * 1024, int(need * 1.4)))

    cost = pl.CostEstimate(
        flops=2 * B * D_in * R + 2 * B * R * D_out,
        transcendentals=0,
        bytes_accessed=(B * D_in * x_itemsize
                        + Kp * R * cd.itemsize
                        + R * D_out * cd.itemsize
                        + B * D_out * out_itemsize),
    )

    x_spec_kwargs = {}
    if x_buffer_count != 2:
        x_spec_kwargs["pipeline_mode"] = pl.Buffered(x_buffer_count)

    kernel = _make_kernel(cd, tk, D_in, has_k_rem, tk_aligned)

    out = pl.pallas_call(
        kernel,
        out_shape=jax.ShapeDtypeStruct((B, D_out), out_dtype),
        grid=grid,
        in_specs=[
            pl.BlockSpec((tb, tk), lambda i, k: (i, k), **x_spec_kwargs),  # x stream
            pl.BlockSpec((Kp, R), lambda i, k: (0, 0)),      # Vt: resident, tiny
            pl.BlockSpec((R, D_out), lambda i, k: (0, 0)),   # Ut: resident, tiny
        ],
        out_specs=pl.BlockSpec((tb, D_out), lambda i, k: (i, 0)),
        scratch_shapes=[pltpu.VMEM((tb, R), jnp.float32)],   # xv accumulator
        compiler_params=pltpu.CompilerParams(
            dimension_semantics=("parallel", "arbitrary"),
            vmem_limit_bytes=vmem_limit_bytes,
        ),
        cost_estimate=cost,
    )(x, Vt, Ut)

    return out


if __name__ == "__main__":
    # Module config (rank < input_dim and rank < output_dim), small demo shapes.
    input_dim, output_dim, rank = 32, 16, 4
    batch = 8

    key = jax.random.PRNGKey(0)
    kx, ku, kv = jax.random.split(key, 3)

    # Deterministic "randn" init, mirroring torch.randn in __init__.
    x = jax.random.normal(kx, (batch, input_dim), dtype=jnp.float32)
    U = jax.random.normal(ku, (output_dim, rank), dtype=jnp.float32)
    V = jax.random.normal(kv, (rank, input_dim), dtype=jnp.float32)

    ref = x @ (U @ V).T

    # f32 path (tight tolerance).
    out = jax.block_until_ready(lowrank_linear(x, U, V))
    assert out.shape == (batch, output_dim)
    assert jnp.allclose(out, ref, atol=1e-4, rtol=1e-4), "f32 mismatch vs reference"

    # bf16 fast path (intended MXU-friendly configuration; halves x HBM bytes
    # when the caller stores x in bf16).
    out_bf16 = jax.block_until_ready(
        lowrank_linear(x, U, V, compute_dtype=jnp.bfloat16))
    rel_err = jnp.max(jnp.abs(out_bf16 - ref)) / jnp.max(jnp.abs(ref))
    assert rel_err < 5e-2, "bf16 mismatch vs reference"

    # Multi-tile sanity check: several batch tiles with a ragged batch
    # remainder (no padding of x), several D_in reduction steps with a ragged
    # K remainder (in-kernel masking), non-multiple-of-128 D_out (direct,
    # unpadded output store).
    kx2, ku2, kv2 = jax.random.split(jax.random.PRNGKey(1), 3)
    B2, Din2, Dout2, R2 = 40, 392, 272, 8
    x2 = jax.random.normal(kx2, (B2, Din2), dtype=jnp.float32)
    U2 = jax.random.normal(ku2, (Dout2, R2), dtype=jnp.float32)
    V2 = jax.random.normal(kv2, (R2, Din2), dtype=jnp.float32)
    out2 = jax.block_until_ready(lowrank_linear(x2, U2, V2, tb=16, tk=128))
    ref2 = x2 @ (U2 @ V2).T
    assert out2.shape == (B2, Dout2)
    assert jnp.allclose(out2, ref2, atol=2e-3, rtol=1e-4), "tiled mismatch vs reference"

    print("KERNEL_OK")
</pallas_src>

<mosaic_0001>
module attributes {stable_mosaic.version = 11 : i64} {
  func.func @kernel(%arg0: i32, %arg1: i32, %arg2: memref<8x32xf32, #tpu.memory_space<vmem>>, %arg3: memref<32x4xf32, #tpu.memory_space<vmem>>, %arg4: memref<4x16xf32, #tpu.memory_space<vmem>>, %arg5: memref<8x16xf32, #tpu.memory_space<vmem>>, %arg6: memref<8x4xf32, #tpu.memory_space<vmem>>) attributes {dimension_semantics = [#tpu.dimension_semantics<parallel>, #tpu.dimension_semantics<arbitrary>], iteration_bounds = array<i64: 1, 1>, scalar_prefetch = 0 : i64, scratch_operands = 1 : i64, tpu.core_type = #tpu.core_type<tc>, window_params = [{transform_indices = @transform_0, window_bounds = array<i64: 8, 32>}, {pipeline_mode = #tpu.pipeline_mode<synchronous>, transform_indices = @transform_1, window_bounds = array<i64: 32, 4>}, {pipeline_mode = #tpu.pipeline_mode<synchronous>, transform_indices = @transform_2, window_bounds = array<i64: 4, 16>}, {transform_indices = @transform_3, window_bounds = array<i64: 8, 16>}]} {
    %c0_i32 = arith.constant 0 : i32
    %0 = arith.cmpi eq, %arg1, %c0_i32 : i32
    %1 = arith.extui %0 : i1 to i32
    %c0_i32_0 = arith.constant 0 : i32
    %2 = arith.cmpi ne, %1, %c0_i32_0 : i32
    scf.if %2 {
      %cst_9 = arith.constant 0.000000e+00 : f32
      %14 = vector.broadcast %cst_9 : f32 to vector<8x4xf32>
      %c0_10 = arith.constant 0 : index
      %c0_11 = arith.constant 0 : index
      %15 = vector.load %arg6[%c0_10, %c0_11] : memref<8x4xf32, #tpu.memory_space<vmem>>, vector<8x4xf32>
      tpu.vector_store %arg6[%c0_10, %c0_11], %14 {strides = array<i32>} : memref<8x4xf32, #tpu.memory_space<vmem>>, vector<8x4xf32>,
    } else {
    }
    %c0 = arith.constant 0 : index
    %c0_1 = arith.constant 0 : index
    %3 = vector.load %arg2[%c0, %c0_1] : memref<8x32xf32, #tpu.memory_space<vmem>>, vector<8x32xf32>
    %c32_i32 = arith.constant 32 : i32
    %4 = arith.muli %arg1, %c32_i32 : i32
    %5 = arith.index_cast %4 : i32 to index
    %c0_2 = arith.constant 0 : index
    %6 = vector.load %arg3[%5, %c0_2] : memref<32x4xf32, #tpu.memory_space<vmem>>, vector<32x4xf32>
    %c0_3 = arith.constant 0 : index
    %c0_4 = arith.constant 0 : index
    %7 = vector.load %arg6[%c0_3, %c0_4] : memref<8x4xf32, #tpu.memory_space<vmem>>, vector<8x4xf32>
    %cst = arith.constant dense<0.000000e+00> : vector<8x4xf32>
    %8 = tpu.matmul %3, %6, %cst {dimension_numbers = #tpu.dot_dimension_numbers<[1], [0], [0], [1], [0, 0, 1, 1], [], []>} : vector<8x32xf32>, vector<32x4xf32>, vector<8x4xf32> -> vector<8x4xf32>
    %9 = arith.addf %7, %8 : vector<8x4xf32>
    %c0_5 = arith.constant 0 : index
    %c0_6 = arith.constant 0 : index
    %10 = vector.load %arg6[%c0_5, %c0_6] : memref<8x4xf32, #tpu.memory_space<vmem>>, vector<8x4xf32>
    tpu.vector_store %arg6[%c0_5, %c0_6], %9 {strides = array<i32>} : memref<8x4xf32, #tpu.memory_space<vmem>>, vector<8x4xf32>,
    %c0_i32_7 = arith.constant 0 : i32
    %11 = arith.cmpi eq, %arg1, %c0_i32_7 : i32
    %12 = arith.extui %11 : i1 to i32
    %c0_i32_8 = arith.constant 0 : i32
    %13 = arith.cmpi ne, %12, %c0_i32_8 : i32
    scf.if %13 {
      %c0_9 = arith.constant 0 : index
      %c0_10 = arith.constant 0 : index
      %14 = vector.load %arg6[%c0_9, %c0_10] : memref<8x4xf32, #tpu.memory_space<vmem>>, vector<8x4xf32>
      %c0_11 = arith.constant 0 : index
      %c0_12 = arith.constant 0 : index
      %15 = vector.load %arg4[%c0_11, %c0_12] : memref<4x16xf32, #tpu.memory_space<vmem>>, vector<4x16xf32>
      %cst_13 = arith.constant dense<0.000000e+00> : vector<8x16xf32>
      %16 = tpu.matmul %14, %15, %cst_13 {dimension_numbers = #tpu.dot_dimension_numbers<[1], [0], [0], [1], [0, 0, 1, 1], [], []>} : vector<8x4xf32>, vector<4x16xf32>, vector<8x16xf32> -> vector<8x16xf32>
      %c0_14 = arith.constant 0 : index
      %c0_15 = arith.constant 0 : index
      %17 = vector.load %arg5[%c0_14, %c0_15] : memref<8x16xf32, #tpu.memory_space<vmem>>, vector<8x16xf32>
      tpu.vector_store %arg5[%c0_14, %c0_15], %16 {strides = array<i32>} : memref<8x16xf32, #tpu.memory_space<vmem>>, vector<8x16xf32>,
    } else {
    }
    return
  }
  func.func @transform_0(%arg0: i32, %arg1: i32) -> (i32, i32) {
    %c0_i32 = arith.constant 0 : i32
    return %arg0, %arg1 : i32, i32
  }
  func.func @transform_1(%arg0: i32, %arg1: i32) -> (i32, i32) {
    %c0_i32 = arith.constant 0 : i32
    %c0_i32_0 = arith.constant 0 : i32
    %c0_i32_1 = arith.constant 0 : i32
    return %c0_i32, %c0_i32_0 : i32, i32
  }
  func.func @transform_2(%arg0: i32, %arg1: i32) -> (i32, i32) {
    %c0_i32 = arith.constant 0 : i32
    %c0_i32_0 = arith.constant 0 : i32
    %c0_i32_1 = arith.constant 0 : i32
    return %c0_i32, %c0_i32_0 : i32, i32
  }
  func.func @transform_3(%arg0: i32, %arg1: i32) -> (i32, i32) {
    %c0_i32 = arith.constant 0 : i32
    %c0_i32_0 = arith.constant 0 : i32
    return %arg0, %c0_i32 : i32, i32
  }
}

</mosaic_0001>

<bundles_post_ra>
// kernel: tpu_custom_call.1
= control target key start
LH: loop header
LB: loop body
LE: loop exit
PB: predicated region body
PF: predicated region fallthrough
CT: control target
= control target key end

     0   :  { %vm19_vm0 = vcmask 31744   ;;  %v137_v2 = vmov 0.0   ;;  %s183_s0 = inlined_call_operand.vmem [shape: f32[8,32], index: 0, kind: input, shape index: {}]   ;;  %s184_s1 = inlined_call_operand.vmem [shape: f32[32,4], index: 1, kind: input, shape index: {}]   ;;  %s185_s2 = inlined_call_operand.vmem [shape: f32[4,16], index: 2, kind: input, shape index: {}]   ;;  %s186_s3 = inlined_call_operand.hbm [shape: f32[8,16], index: 3, kind: output, shape index: {}]  }
   0x1   :  { %v27_v0 = vld [vmem:[%s184_s1 + $0x18] sm:$0xff]  ;;  %v26_v1 = vld [vmem:[%s184_s1 + $0x10] sm:$0xff]  ;;  %20 = vst.msk [vmem:[#allocation2] sm:$0xff] %vm19_vm0, %v137_v2 }
   0x2   :  { %45 = vmatpush.msra.mxu0 %v27_v0 }
   0x3   :  { %8 = vsyncpa [#allocation4], 0  ;;  %v25_v3 = vld [vmem:[%s184_s1 + $0x8] sm:$0xff]  ;;  %v24_v4 = vld [vmem:[%s184_s1] sm:$0xff]  ;;  %vm29_vm1 = vcmask 261120   ;;  %vm64_vm2 = vcmask 1043456  }
   0x4   :  { %46 = vmatpush.msra.mxu0 %v26_v1  ;;  %v21_v5 = vld [vmem:[%s183_s0] sm:$0xff]  ;;  %s138_s1 = smov [#allocation3]   ;;  %s97_s26 = sshll.u32 %s186_s3, 4  ;;  %vm88_vm3 = vcmask 130048   ;;  %s98_s26 = int_to_ptr.hbm [resolvable:$true] %s97_s26 }
   0x5   :  { %v60_v6 = vld [vmem:[%s185_s2] sm:$0xf]  ;;  %s95_s24 = sshll.u32 %s138_s1, 4  ;;  %s96_s24 = int_to_ptr.vmem [resolvable:$true] %s95_s24 }
   0x6   :  { %47 = vmatpush.msra.mxu0 %v25_v3  ;;  %107 = vmatpush.msk.msra.mxu1 %vm64_vm2, %v60_v6 }
   0x8   :  { %48 = vmatpush.msra.mxu0 %v24_v4  ;;  %v28_v7 = vld [vmem:[#allocation2] sm:$0xff] }
   0x9   :  { %106 = vmatmul.msk.f32.vlgmr.msra.gmra.mxu0 %vm29_vm1, %v21_v5 }
  0x86   :  { %v50_v8 = vpop.f32.mrf.mxu0 }
  0x87   :  { %v53_v9 = vadd.f32 %v50_v8, %v28_v7 }
  0x89   :  { %55 = vst.msk [vmem:[#allocation2] sm:$0xff] %vm19_vm0, %v53_v9 }
  0x90   :  { %v59_v10 = vld [vmem:[#allocation2] sm:$0xff] }
  0x91   :  { %108 = vmatmul.msk.f32.vlgmr.msra.gmra.mxu1 %vm19_vm0, %v59_v10 }
 0x10e   :  { %v85_v11 = vpop.f32.mrf.mxu1 }
 0x10f   :  { %89 = vst.msk [vmem:[#allocation3] sm:$0xff] %vm88_vm3, %v85_v11 }
 0x110   :  { %100 = dma.vmem_to_hbm [thread:$0]  %s96_s24, 128, %s98_s26, [#allocation4]  }
 0x111   :  { %135 = dma.done.wait [#allocation4], 128  }
 0x112   :  { %136 = vsyncadd [#allocation4], 4294967168 }
 0x113   :  { %105 = vsyncpa [#allocation4], 1 }

</bundles_post_ra>
